<compile_context>
chip_gen: v6e
topology: v6e:2x2x1
jax: 0.10.0
libtpu: 0.0.40
codegen_flags: <defaults>
</compile_context>

<pallas_src>
import jax
import jax.numpy as jnp
from jax.experimental import pallas as pl
from jax.experimental.pallas import tpu as pltpu


_NEG_BIG = -1e30  # bias for fake (padded) class columns: never the argmax, exp -> 0


def _round_up(x, m):
    return ((x + m - 1) // m) * m


def _elu(v):
    # ELU(alpha=1), eval mode.
    # TODO(synk): switch to jnp.expm1 (single EUP op, exact near 0) once it is
    # confirmed in the Mosaic TPU lowering set; exp(min(v,0))-1 is guaranteed
    # to lower and the cancellation near 0 is ~1e-7 absolute (negligible here).
    return jnp.where(v > 0.0, v, jnp.exp(jnp.minimum(v, 0.0)) - 1.0)


def _make_kernel(h0, r_b1, r_w2, r_b2, lw):
    """Kernel over one row tile.  Static offsets into the packed param buffer."""

    def kernel(x_ref, p_ref, tgt_ref, pred_ref, nll_ref):
        x = x_ref[...]                                   # (TM, H0) f32

        # Static slices of the single packed parameter buffer (all 8-aligned).
        w1 = p_ref[0:h0, :]                              # folded Wp@W1   (H0, LW)
        b1 = p_ref[r_b1:r_b1 + 1, :]                     # folded bias    (1,  LW)
        w2 = p_ref[r_w2:r_w2 + lw, :]                    # linear1_ W     (LW, LW)
        b2 = p_ref[r_b2:r_b2 + 1, :]                     # linear1_ b     (1,  LW)

        # prediction (FF part) folded with linear1, then ELU.
        h = jnp.dot(x, w1, preferred_element_type=jnp.float32) + b1
        h = _elu(h)                                      # padded cols stay exactly 0

        # linear1_ -> logits over 128 padded classes (pad cols == -1e30).
        logits = jnp.dot(h, w2, preferred_element_type=jnp.float32) + b2

        # log_softmax(dim=1) -- padded classes underflow to 0 in the sum.
        m = jnp.max(logits, axis=-1, keepdims=True)
        z = logits - m
        logp = z - jnp.log(jnp.sum(jnp.exp(z), axis=-1, keepdims=True))

        # Per-row NLL via one-hot gather; padded rows carry tgt = -1 -> zero.
        cls = jax.lax.broadcasted_iota(jnp.int32, logits.shape, 1)
        onehot = (cls == tgt_ref[...]).astype(jnp.float32)
        nll_ref[...] = -jnp.sum(logp * onehot, axis=-1, keepdims=True)

        # logits2tag: first index attaining the max (reuses z and cls).
        pred_ref[...] = jnp.min(jnp.where(z == 0.0, cls, lw), axis=-1, keepdims=True)

    return kernel


def sentence_bilstm_crf_forward(x, params, tgt, *, tm=None):
    """x: [N, H0] f32 node features, tgt: [N] int gold tags -> (loss, pred)."""
    N, H0 = x.shape
    H = params["w1"].shape[1]
    C = params["w2"].shape[1]
    LW = 128 * pl.cdiv(max(H, C), 128)                   # lane-dense padded width

    # ---- row tiling -------------------------------------------------------
    if tm is None:
        tm = 512 if N >= 512 else _round_up(N, 8)
    tm = max(8, _round_up(min(tm, 512), 8))
    Npad = _round_up(N, tm)
    grid = (Npad // tm,)

    # ---- fold prediction-FF with linear1 (exact in eval: no nonlinearity) --
    w1f = params["wp"] @ params["w1"]                    # (H0, H)
    b1f = params["bp"] @ params["w1"] + params["b1"]     # (1,  H)

    # ---- pack all params into one lane-dense VMEM buffer -------------------
    r_b1 = _round_up(H0, 8)
    r_w2 = r_b1 + 8
    r_b2 = r_w2 + LW
    PR = r_b2 + 8

    pbuf = jnp.zeros((PR, LW), jnp.float32)
    pbuf = pbuf.at[:H0, :H].set(w1f)
    pbuf = pbuf.at[r_b1, :H].set(b1f[0])
    pbuf = pbuf.at[r_w2:r_w2 + H, :C].set(params["w2"])
    b2row = jnp.full((LW,), _NEG_BIG, jnp.float32).at[:C].set(params["b2"][0])
    pbuf = pbuf.at[r_b2, :].set(b2row)

    # ---- pad rows; padded rows get tgt = -1 so they never touch the loss ---
    xpad = jnp.zeros((Npad, H0), jnp.float32).at[:N, :].set(x.astype(jnp.float32))
    tgt2d = jnp.full((Npad, 1), -1, jnp.int32).at[:N, 0].set(tgt.astype(jnp.int32))

    kernel = _make_kernel(H0, r_b1, r_w2, r_b2, LW)

    pred_pad, nll_pad = pl.pallas_call(
        kernel,
        out_shape=(
            jax.ShapeDtypeStruct((Npad, 1), jnp.int32),    # predicted tags
            jax.ShapeDtypeStruct((Npad, 1), jnp.float32),  # per-row NLL
        ),
        grid_spec=pltpu.PrefetchScalarGridSpec(
            num_scalar_prefetch=0,
            grid=grid,
            in_specs=[
                pl.BlockSpec((tm, H0), lambda i: (i, 0)),   # x row tile
                pl.BlockSpec((PR, LW), lambda i: (0, 0)),   # packed params, resident
                pl.BlockSpec((tm, 1), lambda i: (i, 0)),    # targets
            ],
            out_specs=(
                pl.BlockSpec((tm, 1), lambda i: (i, 0)),
                pl.BlockSpec((tm, 1), lambda i: (i, 0)),
            ),
        ),
        compiler_params=pltpu.CompilerParams(
            dimension_semantics=("parallel",)),
    )(xpad, pbuf, tgt2d)

    pred = pred_pad[:N, 0]
    loss = jnp.sum(nll_pad[:, 0]) / jnp.float32(N)       # padded rows contribute 0
    return loss, pred


def _init_linear(key, fan_in, fan_out):
    """PyTorch nn.Linear default init; weight stored transposed as [in, out]."""
    kw, kb = jax.random.split(key)
    bound = 1.0 / jnp.sqrt(jnp.float32(fan_in))
    w = jax.random.uniform(kw, (fan_in, fan_out), jnp.float32, -bound, bound)
    b = jax.random.uniform(kb, (1, fan_out), jnp.float32, -bound, bound)
    return w, b


if __name__ == "__main__":
    # Small shapes consistent with the module: init_hidden_size=32,
    # hidden_size=32, num_class=8; batched graph = 3 sentences (8+7+5 tokens).
    H0, H, C = 32, 32, 8
    sent_lens = [8, 7, 5]
    N = sum(sent_lens)                                    # 20 graph nodes

    key = jax.random.PRNGKey(0)
    k_x, k_t, kp, k1, k2 = jax.random.split(key, 5)

    params = {}
    # TODO(synk): the BiLSTM recurrence of BiLSTMFeedForwardNN (external
    # graph4nlp module) is not reproduced; only its feed-forward H0->H0
    # projection is modeled by (wp, bp).
    params["wp"], params["bp"] = _init_linear(kp, H0, H0)  # prediction FF part
    params["w1"], params["b1"] = _init_linear(k1, H0, H)   # linear1
    params["w2"], params["b2"] = _init_linear(k2, H, C)    # linear1_

    x = jax.random.normal(k_x, (N, H0), jnp.float32)       # node features
    tgt = jax.random.randint(k_t, (N,), 0, C, jnp.int32)   # torch.cat(tgt_tags)

    # tm=8 -> 3-tile grid: exercises row tiling, masking and parallel sharding.
    loss, pred = sentence_bilstm_crf_forward(x, params, tgt, tm=8)
    jax.block_until_ready((loss, pred))

    # Pure-JAX reference of the module's eval forward (unfolded weights).
    h_ref = x @ params["wp"] + params["bp"]
    h_ref = jax.nn.elu(h_ref @ params["w1"] + params["b1"])
    ref_logits = h_ref @ params["w2"] + params["b2"]
    ref_logp = jax.nn.log_softmax(ref_logits, axis=-1)
    ref_loss = -jnp.mean(ref_logp[jnp.arange(N), tgt])
    ref_pred = jnp.argmax(ref_logits, axis=-1)

    assert pred.shape == (N,) and loss.shape == ()
    assert bool(jnp.isfinite(loss))
    assert bool(jnp.all((pred >= 0) & (pred < C)))
    assert bool(jnp.allclose(loss, ref_loss, rtol=2e-3, atol=2e-3)), (loss, ref_loss)
    assert bool(jnp.all(pred == ref_pred))
    print("KERNEL_OK")
</pallas_src>

<mosaic_0001>
module attributes {stable_mosaic.version = 11 : i64} {
  func.func @kernel(%arg0: i32, %arg1: memref<8x32xf32, #tpu.memory_space<vmem>>, %arg2: memref<176x128xf32, #tpu.memory_space<vmem>>, %arg3: memref<8x1xi32, #tpu.memory_space<vmem>>, %arg4: memref<8x1xi32, #tpu.memory_space<vmem>>, %arg5: memref<8x1xf32, #tpu.memory_space<vmem>>) attributes {dimension_semantics = [#tpu.dimension_semantics<parallel>], iteration_bounds = array<i64: 3>, scalar_prefetch = 0 : i64, scratch_operands = 0 : i64, tpu.core_type = #tpu.core_type<tc>, window_params = [{transform_indices = @transform_0, window_bounds = array<i64: 8, 32>}, {pipeline_mode = #tpu.pipeline_mode<synchronous>, transform_indices = @transform_1, window_bounds = array<i64: 176, 128>}, {transform_indices = @transform_2, window_bounds = array<i64: 8, 1>}, {transform_indices = @transform_3, window_bounds = array<i64: 8, 1>}, {transform_indices = @transform_4, window_bounds = array<i64: 8, 1>}]} {
    %c0 = arith.constant 0 : index
    %c0_0 = arith.constant 0 : index
    %0 = vector.load %arg1[%c0, %c0_0] : memref<8x32xf32, #tpu.memory_space<vmem>>, vector<8x32xf32>
    %c0_1 = arith.constant 0 : index
    %c0_2 = arith.constant 0 : index
    %1 = vector.load %arg2[%c0_1, %c0_2] : memref<176x128xf32, #tpu.memory_space<vmem>>, vector<32x128xf32>
    %c32 = arith.constant 32 : index
    %c0_3 = arith.constant 0 : index
    %2 = vector.load %arg2[%c32, %c0_3] : memref<176x128xf32, #tpu.memory_space<vmem>>, vector<1x128xf32>
    %c40 = arith.constant 40 : index
    %c0_4 = arith.constant 0 : index
    %3 = vector.load %arg2[%c40, %c0_4] : memref<176x128xf32, #tpu.memory_space<vmem>>, vector<128x128xf32>
    %c168 = arith.constant 168 : index
    %c0_5 = arith.constant 0 : index
    %4 = vector.load %arg2[%c168, %c0_5] : memref<176x128xf32, #tpu.memory_space<vmem>>, vector<1x128xf32>
    %cst = arith.constant dense<0.000000e+00> : vector<8x128xf32>
    %5 = tpu.matmul %0, %1, %cst {dimension_numbers = #tpu.dot_dimension_numbers<[1], [0], [0], [1], [0, 0, 1, 1], [], []>} : vector<8x32xf32>, vector<32x128xf32>, vector<8x128xf32> -> vector<8x128xf32>
    %6 = vector.broadcast %2 : vector<1x128xf32> to vector<8x128xf32>
    %7 = arith.addf %5, %6 : vector<8x128xf32>
    %cst_6 = arith.constant 0.000000e+00 : f32
    %8 = vector.broadcast %cst_6 : f32 to vector<8x128xf32>
    %9 = arith.cmpf ogt, %7, %8 : vector<8x128xf32>
    %cst_7 = arith.constant 0.000000e+00 : f32
    %10 = vector.broadcast %cst_7 : f32 to vector<8x128xf32>
    %11 = arith.minimumf %7, %10 : vector<8x128xf32>
    %12 = math.exp %11 : vector<8x128xf32>
    %cst_8 = arith.constant 1.000000e+00 : f32
    %13 = vector.broadcast %cst_8 : f32 to vector<8x128xf32>
    %14 = arith.subf %12, %13 : vector<8x128xf32>
    %15 = arith.select %9, %7, %14 : vector<8x128xi1>, vector<8x128xf32>
    %cst_9 = arith.constant dense<0.000000e+00> : vector<8x128xf32>
    %16 = tpu.matmul %15, %3, %cst_9 {dimension_numbers = #tpu.dot_dimension_numbers<[1], [0], [0], [1], [0, 0, 1, 1], [], []>} : vector<8x128xf32>, vector<128x128xf32>, vector<8x128xf32> -> vector<8x128xf32>
    %17 = vector.broadcast %4 : vector<1x128xf32> to vector<8x128xf32>
    %18 = arith.addf %16, %17 : vector<8x128xf32>
    %cst_10 = arith.constant dense<0xFF800000> : vector<8xf32>
    %19 = vector.multi_reduction <maximumf>, %18, %cst_10 [1] : vector<8x128xf32> to vector<8xf32>
    %20 = vector.shape_cast %19 : vector<8xf32> to vector<8x1xf32>
    %21 = vector.broadcast %20 : vector<8x1xf32> to vector<8x128xf32>
    %22 = arith.subf %18, %21 : vector<8x128xf32>
    %23 = math.exp %22 : vector<8x128xf32>
    %cst_11 = arith.constant dense<0.000000e+00> : vector<8xf32>
    %24 = vector.multi_reduction <add>, %23, %cst_11 [1] : vector<8x128xf32> to vector<8xf32>
    %25 = vector.shape_cast %24 : vector<8xf32> to vector<8x1xf32>
    %26 = math.log %25 : vector<8x1xf32>
    %27 = vector.broadcast %26 : vector<8x1xf32> to vector<8x128xf32>
    %28 = arith.subf %22, %27 : vector<8x128xf32>
    %29 = tpu.iota {dimensions = array<i32: 1>} : vector<8x128xi32>
    %c0_12 = arith.constant 0 : index
    %c0_13 = arith.constant 0 : index
    %30 = vector.load %arg3[%c0_12, %c0_13] : memref<8x1xi32, #tpu.memory_space<vmem>>, vector<8x1xi32>
    %31 = vector.broadcast %30 : vector<8x1xi32> to vector<8x128xi32>
    %32 = arith.cmpi eq, %29, %31 : vector<8x128xi32>
    %33 = arith.extui %32 : vector<8x128xi1> to vector<8x128xi32>
    %34 = arith.sitofp %33 : vector<8x128xi32> to vector<8x128xf32>
    %35 = arith.mulf %28, %34 : vector<8x128xf32>
    %cst_14 = arith.constant dense<0.000000e+00> : vector<8xf32>
    %36 = vector.multi_reduction <add>, %35, %cst_14 [1] : vector<8x128xf32> to vector<8xf32>
    %37 = vector.shape_cast %36 : vector<8xf32> to vector<8x1xf32>
    %cst_15 = arith.constant 0.000000e+00 : f32
    %38 = vector.broadcast %cst_15 : f32 to vector<8x1xf32>
    %39 = arith.subf %38, %37 : vector<8x1xf32>
    %c0_16 = arith.constant 0 : index
    %c0_17 = arith.constant 0 : index
    %40 = vector.load %arg5[%c0_16, %c0_17] : memref<8x1xf32, #tpu.memory_space<vmem>>, vector<8x1xf32>
    tpu.vector_store %arg5[%c0_16, %c0_17], %39 {strides = array<i32>} : memref<8x1xf32, #tpu.memory_space<vmem>>, vector<8x1xf32>,
    %cst_18 = arith.constant 0.000000e+00 : f32
    %41 = vector.broadcast %cst_18 : f32 to vector<8x128xf32>
    %42 = arith.cmpf oeq, %22, %41 : vector<8x128xf32>
    %c128_i32 = arith.constant 128 : i32
    %43 = vector.broadcast %c128_i32 : i32 to vector<8x128xi32>
    %44 = arith.select %42, %29, %43 : vector<8x128xi1>, vector<8x128xi32>
    %cst_19 = arith.constant dense<2147483647> : vector<8xi32>
    %45 = vector.multi_reduction <minsi>, %44, %cst_19 [1] : vector<8x128xi32> to vector<8xi32>
    %46 = vector.shape_cast %45 : vector<8xi32> to vector<8x1xi32>
    %c0_20 = arith.constant 0 : index
    %c0_21 = arith.constant 0 : index
    %47 = vector.load %arg4[%c0_20, %c0_21] : memref<8x1xi32, #tpu.memory_space<vmem>>, vector<8x1xi32>
    tpu.vector_store %arg4[%c0_20, %c0_21], %46 {strides = array<i32>} : memref<8x1xi32, #tpu.memory_space<vmem>>, vector<8x1xi32>,
    return
  }
  func.func @transform_0(%arg0: i32) -> (i32, i32) {
    %c0_i32 = arith.constant 0 : i32
    %c0_i32_0 = arith.constant 0 : i32
    return %arg0, %c0_i32 : i32, i32
  }
  func.func @transform_1(%arg0: i32) -> (i32, i32) {
    %c0_i32 = arith.constant 0 : i32
    %c0_i32_0 = arith.constant 0 : i32
    %c0_i32_1 = arith.constant 0 : i32
    return %c0_i32, %c0_i32_0 : i32, i32
  }
  func.func @transform_2(%arg0: i32) -> (i32, i32) {
    %c0_i32 = arith.constant 0 : i32
    %c0_i32_0 = arith.constant 0 : i32
    return %arg0, %c0_i32 : i32, i32
  }
  func.func @transform_3(%arg0: i32) -> (i32, i32) {
    %c0_i32 = arith.constant 0 : i32
    %c0_i32_0 = arith.constant 0 : i32
    return %arg0, %c0_i32 : i32, i32
  }
  func.func @transform_4(%arg0: i32) -> (i32, i32) {
    %c0_i32 = arith.constant 0 : i32
    %c0_i32_0 = arith.constant 0 : i32
    return %arg0, %c0_i32 : i32, i32
  }
}

</mosaic_0001>

<bundles_post_ra>
// kernel: tpu_custom_call.1
= control target key start
LH: loop header
LB: loop body
LE: loop exit
PB: predicated region body
PF: predicated region fallthrough
CT: control target
= control target key end

     0   :  { %10 = vsyncpa [#allocation3], 0  ;;  %s754_s15 = smov 0   ;;  %s828_s0 = inlined_call_operand.vmem [shape: f32[24,32], index: 0, kind: input, shape index: {}]   ;;  %s829_s1 = inlined_call_operand.hbm [shape: f32[176,128], index: 1, kind: input, shape index: {}]   ;;  %s830_s2 = inlined_call_operand.vmem [shape: s32[24,1], index: 2, kind: input, shape index: {}]   ;;  %s831_s3 = inlined_call_operand.vmem [shape: s32[24,1], index: 3, kind: output, shape index: {0}]   ;;  %s832_s4 = inlined_call_operand.vmem [shape: f32[24,1], index: 4, kind: output, shape index: {1}]  }
   0x1 LB: > { %s760_s16 = sadd.s32 4294967295, %s721_s15   ;;  %p569_p0 = scmp.ge.s32.totalorder %s721_s15, 1  ;;  %s721_s15 = sphi %s754_s15, %s16_s15  }
   0x2   : > { %p146_p1 = scmp.lt.s32.totalorder %s721_s15, 4  ;;  %s723_s17 = smov [#allocation2]  }
   0x3   : > { %s158_s18 = sshll.u32 %s723_s17, 4  ;;  %p661_p3 = scmp.eq.s32.totalorder %s760_s16, 0  ;;  %s159_s18 = int_to_ptr.vmem [resolvable:$true] %s158_s18 }
   0x4   : > { %p764_p2 = pnand %p569_p0, %p146_p1  ;;  %s696_s20 = scalar_lea.vmem %s159_s18, 2816 }
   0x5   : > { %p697_p7 = scmp.ne.s32.totalorder %s159_s18, %s696_s20  ;;  %p704_p10 = scmp.lt.s32.totalorder %s159_s18, %s159_s18 }
   0x6   : > { %p657_p4 = pneg %p764_p2  ;;  %p705_p11 = scmp.lt.s32.totalorder %s696_s20, %s696_s20 }
   0x8   : > { %p658_p5 = pnand %p661_p3, %p657_p4  ;;  %p706_p12 = por %p705_p11, %p704_p10 }
   0xa   : > { %p687_p6 = pneg %p658_p5 }
   0xc   : > { %p699_p8 = pnand %p697_p7, %p687_p6 }
   0xe   : > { %p700_p9 = pneg %p699_p8 }
  0x10   : > { %p707_p13 = pnand %p706_p12, %p700_p9 }
  0x12   : > { %710 = shalt.err (!%p707_p13)
}
  0x13   : > { %s724_s21 = smov 128   ;;  %s725_s22 = smov 8  }
  0x14   : > { %660 = dma.hbm_to_vmem [thread:$0]  (!%p658_p5), %s829_s1, 2816, %s159_s18, [#allocation3], %s724_s21, %s724_s21, %s725_s22  }
  0x15   : > { %188 = sbr.rel (%p764_p2) target bundleno = 903 (0x387), region = 32 }
  0x1a   : > { %716 = dma.done.wait (%p661_p3), [#allocation3], 2816  }
  0x1b   : > { %718 = vsyncadd (%p661_p3), [#allocation3], 4294964480  ;;  %p220_p0 = scmp.lt.s32.totalorder %s760_s16, 2  ;;  %v726_v0 = vmov 0.0   ;;  %vm727_vm0 = vmmov 0   ;;  %v240_v1 = vld [vmem:[#allocation2 + $0x18] sm:$0xff]  ;;  %v427_v36 = vlaneseq }
  0x1c   : > { %607 = vmatprep.subr.mxu0 %v726_v0  ;;  %615 = vmatprep.mubr.msk.f32.mxu0 %vm727_vm0, %v726_v0  ;;  %v239_v2 = vld [vmem:[#allocation2 + $0x10] sm:$0xff]  ;;  %v257_v3 = vld [vmem:[#allocation2 + $0xa0] sm:$0xff]  ;;  %v238_v4 = vld [vmem:[#allocation2 + $0x8] sm:$0xff]  ;;  %vm263_vm1 = vcmask 261120   ;;  %v728_v35 = vmov 0   ;;  %vm440_vm6 = vcmask 7168  }
  0x1d   : > { %s835_s16 = smov (!%p220_p0, %s760_s16), 2  ;;  %618 = vmatprep.subr.mxu1 %v726_v0  ;;  %650 = vmatprep.mubr.msk.f32.mxu1 %vm727_vm0, %v726_v0  ;;  %v256_v5 = vld [vmem:[#allocation2 + $0x98] sm:$0xff]  ;;  %v255_v6 = vld [vmem:[#allocation2 + $0x90] sm:$0xff]  ;;  %v237_v7 = vld [vmem:[#allocation2] sm:$0xff]  ;;  %v428_v38 = vand.u32 127, %v427_v36 }
  0x1e   : > { %s788_s25 = sshll.u32 %s835_s16, 3  ;;  %608 = vmatpush3.msra.mxu0 %v240_v1  ;;  %619 = vmatpush3.msra.mxu1 %v257_v3  ;;  %v254_v9 = vld [vmem:[#allocation2 + $0x88] sm:$0xff]  ;;  %v253_v10 = vld [vmem:[#allocation2 + $0x80] sm:$0xff]  ;;  %v252_v11 = vld [vmem:[#allocation2 + $0x78] sm:$0xff] }
  0x1f   : > { %609 = vmatprep.subr.mxu0 %v726_v0  ;;  %s223_s28 = scalar_lea.vmem %s828_s0, %s788_s25  ;;  %620 = vmatprep.subr.mxu1 %v726_v0  ;;  %v251_v12 = vld [vmem:[#allocation2 + $0x70] sm:$0xff]  ;;  %v250_v13 = vld [vmem:[#allocation2 + $0x68] sm:$0xff]  ;;  %v249_v14 = vld [vmem:[#allocation2 + $0x60] sm:$0xff]  ;;  %s227_s5 = scalar_lea.vmem %s830_s2, %s788_s25 }
  0x20   : > { %610 = vmatpush3.msra.mxu0 %v239_v2  ;;  %621 = vmatpush3.msra.mxu1 %v256_v5  ;;  %v236_v8 = vld [vmem:[%s223_s28] sm:$0xff]  ;;  %v248_v15 = vld [vmem:[#allocation2 + $0x58] sm:$0xff]  ;;  %v247_v16 = vld [vmem:[#allocation2 + $0x50] sm:$0xff]  ;;  %s231_s8 = scalar_lea.vmem %s831_s3, %s788_s25  ;;  %s235_s11 = scalar_lea.vmem %s832_s4, %s788_s25 }
  0x21   : > { %611 = vmatprep.subr.mxu0 %v726_v0  ;;  %622 = vmatprep.subr.mxu1 %v726_v0  ;;  %v246_v17 = vld [vmem:[#allocation2 + $0x48] sm:$0xff]  ;;  %v245_v18 = vld [vmem:[#allocation2 + $0x40] sm:$0xff]  ;;  %v244_v19 = vld [vmem:[#allocation2 + $0x38] sm:$0xff] }
  0x22   : > { %612 = vmatpush3.msra.mxu0 %v238_v4  ;;  %623 = vmatpush3.msra.mxu1 %v255_v6  ;;  %v243_v20 = vld [vmem:[#allocation2 + $0x30] sm:$0xff]  ;;  %v242_v21 = vld [vmem:[#allocation2 + $0x28] sm:$0xff]  ;;  %v578_v22 = vld [vmem:[#allocation2 + $0x20] ss:$0 sm:$0xff] }
  0x23   : > { %613 = vmatprep.subr.mxu0 %v726_v0  ;;  %624 = vmatprep.subr.mxu1 %v726_v0  ;;  %v581_v31 = vld [vmem:[#allocation2 + $0xa8] ss:$0 sm:$0xff]  ;;  %v429_v45 = vld [vmem:[%s227_s5] sm:$0xff] }
  0x24   : > { %614 = vmatpush3.msra.mxu0 %v237_v7  ;;  %625 = vmatpush3.msra.mxu1 %v254_v9 }
  0x25   : > { %616 = vmatmul.mubr.msk.f32.vlgmr.msra.gmra.mxu0 %vm263_vm1, %v236_v8  ;;  %626 = vmatprep.subr.mxu1 %v726_v0 }
  0x26   : > { %627 = vmatpush3.msra.mxu1 %v253_v10  ;;  %677 = vset.pattern.permute.xlu1 %v728_v35 }
  0x27   : > { %628 = vmatprep.subr.mxu1 %v726_v0  ;;  %678 = vset.pattern.permute.xlu0 %v728_v35 }
  0x28   : > { %629 = vmatpush3.msra.mxu1 %v252_v11 }
  0x29   : > { %630 = vmatprep.subr.mxu1 %v726_v0 }
  0x2a   : > { %631 = vmatpush3.msra.mxu1 %v251_v12 }
  0x2b   : > { %632 = vmatprep.subr.mxu1 %v726_v0 }
  0x2c   : > { %633 = vmatpush3.msra.mxu1 %v250_v13 }
  0x2d   : > { %634 = vmatprep.subr.mxu1 %v726_v0 }
  0x2e   : > { %635 = vmatpush3.msra.mxu1 %v249_v14 }
  0x2f   : > { %636 = vmatprep.subr.mxu1 %v726_v0 }
  0x30   : > { %637 = vmatpush3.msra.mxu1 %v248_v15 }
  0x31   : > { %638 = vmatprep.subr.mxu1 %v726_v0 }
  0x32   : > { %639 = vmatpush3.msra.mxu1 %v247_v16 }
  0x33   : > { %640 = vmatprep.subr.mxu1 %v726_v0 }
  0x34   : > { %641 = vmatpush3.msra.mxu1 %v246_v17 }
  0x35   : > { %642 = vmatprep.subr.mxu1 %v726_v0 }
  0x36   : > { %643 = vmatpush3.msra.mxu1 %v245_v18 }
  0x37   : > { %644 = vmatprep.subr.mxu1 %v726_v0 }
  0x38   : > { %645 = vmatpush3.msra.mxu1 %v244_v19 }
  0x39   : > { %646 = vmatprep.subr.mxu1 %v726_v0 }
  0x3a   : > { %647 = vmatpush3.msra.mxu1 %v243_v20 }
  0x3b   : > { %648 = vmatprep.subr.mxu1 %v726_v0 }
  0x3c   : > { %649 = vmatpush3.msra.mxu1 %v242_v21 }
  0xe5   : > { %v333_v23 = vpop.f32.mrf.mxu0 }
  0xe6   : > { %v334_v24 = vadd.f32 %v578_v22, %v333_v23 }
  0xe7   : > { %v617_v25 = vpop.f32.mrf.mxu0 }
  0xe8   : > { %v338_v26 = vmin.f32 %v334_v24, 0.0  ;;  %vm337_vm2 = vcmp.gt.f32.partialorder %v334_v24, 0.0 }
  0xea   : > { %v339_v27 = vmul.f32 1.442695, %v338_v26 }
  0xec   : > { %679 = vpow2.f32 %v339_v27 }
  0xf9   : > { %v680_v28 = vpop.eup %679 }
  0xfa   : > { %v580_v29 = vadd.f32 -1.0, %v680_v28 }
  0xfc   : > { %v342_v30 = vsel %vm337_vm2, %v334_v24, %v580_v29 }
  0xfd   : > { %651 = vmatmul.mubr.f32.vlgmr.msra.gmra.mxu1 %v342_v30 }
 0x1bd   : > { %v413_v32 = vpop.f32.mrf.mxu1 }
 0x1be   : > { %v414_v33 = vadd.f32 %v581_v31, %v413_v32 }
 0x1bf   : > { %v652_v34 = vpop.f32.mrf.mxu1 }
 0x1c0   : > { %417 = vmax.xlane.f32.xlu0 %v414_v33 }
 0x249   : > { %v418_v37 = vpop.xlane.xlu0 %417 }
 0x24a   : > { %v419_v39 = vsub.f32 %v414_v33, %v418_v37 }
 0x24c   : > { %v420_v40 = vmul.f32 1.442695, %v419_v39  ;;  %vm442_vm3 = vcmp.eq.f32.partialorder %v419_v39, 0.0 }
 0x24d   : > { %v443_v41 = vsel %vm442_vm3, %v428_v38, 128 }
 0x24e   : > { %681 = vpow2.f32 %v420_v40  ;;  %v445_v42 = vshra.s32 %v443_v41, 16  ;;  %v444_v46 = vand.u32 65535, %v443_v41 }
 0x250   : > { %v447_v43 = vcvt.s32.f32 %v445_v42  ;;  %v446_v48 = vcvt.s32.f32 %v444_v46 }
 0x252   : > { %448 = vmin.xlane.f32.xlu1 %v447_v43 }
 0x25b   : > { %v682_v44 = vpop.eup %681 }
 0x25c   : > { %422 = vadd.xlane.f32.xlu0 %v682_v44 }
 0x263   : > { %431 = vperm.xlu1 %677, %v429_v45  }
 0x2db   : > { %v449_v47 = vpop.xlane.xlu1 %448 }
 0x2dc   : > { %vm450_vm4 = vcmp.eq.f32.partialorder %v447_v43, %v449_v47  ;;  %v455_v57 = vcvt.f32.s32 %v449_v47 }
 0x2dd   : > { %v451_v49 = vsel %vm450_vm4, %v446_v48, inf }
 0x2de   : > { %452 = vmin.xlane.f32.xlu0 %v451_v49  ;;  %v456_v59 = vshll.u32 %v455_v57, 16 }
 0x2df   : > { %v432_v51 = vpop.permute.xlu1 %431 }
 0x2e0   : > { %vm433_vm5 = vcmp.eq.s32.totalorder %v428_v38, %v432_v51 }
 0x2e1   : > { %v582_v54 = vsel %vm433_vm5, 1.0, %v726_v0 }
 0x2e5   : > { %v423_v50 = vpop.xlane.xlu0 %422 }
 0x2e6   : > { %683 = vlog2.f32 %v423_v50 }
 0x2f3   : > { %v684_v52 = vpop.eup %683 }
 0x2f4   : > { %v425_v53 = vmul.f32 0.6931472, %v684_v52 }
 0x2f6   : > { %v426_v55 = vsub.f32 %v419_v39, %v425_v53 }
 0x2f8   : > { %v436_v56 = vmul.f32 %v582_v54, %v426_v55 }
 0x2fa   : > { %437 = vadd.xlane.f32.xlu0 %v436_v56 }
 0x367   : > { %v453_v58 = vpop.xlane.xlu0 %452 }
 0x368   : > { %v454_v60 = vcvt.f32.s32 %v453_v58 }
 0x36a   : > { %v457_v61 = vadd.s32 %v456_v59, %v454_v60 }
 0x36c   : > { %458 = vst.msk [vmem:[%s231_s8] sm:$0xff] %vm440_vm6, %v457_v61 }
 0x383   : > { %v438_v62 = vpop.xlane.xlu0 %437 }
 0x384   : > { %v439_v63 = vsub.f32 0.0, %v438_v62 }
 0x386   : > { %441 = vst.msk [vmem:[%s235_s11] sm:$0xff] %vm440_vm6, %v439_v63 }
 0x387 PF: > { %s16_s15 = sadd.s32 1, %s721_s15  }
 0x388   : > { %p13_p1 = scmp.ge.s32.totalorder %s16_s15, 5  }
 0x38a   :  { %15 = sbr.rel (!%p13_p1) target bundleno = 1 (0x1), region = 82 }
 0x38f   :  { %492 = vsyncpa [#allocation3], 1 }
 0x390   :  { %494 = vsyncpa [#allocation3 + $0x1], 1 }

</bundles_post_ra>
